<compile_context>
chip_gen: v5e
topology: v5e:2x2
jax: 0.10.0
libtpu: 0.0.40
codegen_flags: <defaults>
</compile_context>

<pallas_src>
import jax
import jax.numpy as jnp
from jax.experimental import pallas as pl
from jax.experimental.pallas import tpu as pltpu


def _hbm_copy_kernel(x_hbm, o_hbm, sem):
    # Direct HBM -> HBM DMA: zero compute, no VMEM staging, single descriptor.
    cp = pltpu.make_async_copy(x_hbm, o_hbm, sem)
    cp.start()
    cp.wait()


def pallas_identity_copy(x):
    """Materializing identity: copies `x` into a fresh buffer via one HBM->HBM DMA."""
    n = int(x.size)
    if n == 0 or x.ndim == 0:
        # Nothing worth a DMA descriptor; identity value is preserved either way.
        return x

    itemsize = jnp.dtype(x.dtype).itemsize

    return pl.pallas_call(
        _hbm_copy_kernel,
        out_shape=jax.ShapeDtypeStruct(x.shape, x.dtype),
        in_specs=[pl.BlockSpec(memory_space=pl.ANY)],
        out_specs=pl.BlockSpec(memory_space=pl.ANY),
        scratch_shapes=[pltpu.SemaphoreType.DMA(())],
        compiler_params=pltpu.CompilerParams(has_side_effects=True),
        cost_estimate=pl.CostEstimate(
            flops=0, transcendentals=0, bytes_accessed=2 * n * itemsize
        ),
    )(x)


def transform_forward(x, materialize=False):
    """Identity Transform.forward.

    Fast path (default): return `x` unchanged — zero HBM traffic, which is the
    roofline-optimal implementation of an identity on every TPU generation.
    With materialize=True, runs the Pallas HBM->HBM DMA kernel to produce a
    fresh buffer.
    """
    if materialize:
        return pallas_identity_copy(x)
    return x


def transform_backward(x, materialize=False):
    """Identity Transform.backward — same semantics."""
    return transform_forward(x, materialize=materialize)


class Transform:
    """JAX/Pallas mirror of the PyTorch Transform module (identity)."""

    def __init__(self, **kwargs):
        self.is_pass_required = False

    def forward(self, x, **kwargs):
        return transform_forward(x, materialize=kwargs.get("materialize", False))

    def backward(self, x, **kwargs):
        return transform_backward(x, materialize=kwargs.get("materialize", False))

    def __call__(self, x, **kwargs):
        return self.forward(x, **kwargs)

    def __repr__(self):
        return self.__class__.__name__ + "()"


if __name__ == "__main__":
    key = jax.random.PRNGKey(0)
    # Small NCHW input consistent with typical transform usage.
    x = jax.random.normal(key, (2, 4, 16, 16), dtype=jnp.float32)

    t = Transform()

    # Hot path: identity with zero data movement.
    y_fast = t(x)
    y_fast = jax.block_until_ready(y_fast)
    assert y_fast.shape == x.shape and y_fast.dtype == x.dtype
    assert bool(jnp.all(y_fast == x)), "fast-path identity mismatch"

    # Pallas kernel path: explicit materializing copy via direct HBM->HBM DMA.
    y_copy = t(x, materialize=True)
    y_copy = jax.block_until_ready(y_copy)
    assert y_copy.shape == x.shape, (y_copy.shape, x.shape)
    assert y_copy.dtype == x.dtype, (y_copy.dtype, x.dtype)
    assert bool(jnp.all(y_copy == x)), "identity kernel output mismatch"

    # Also exercise backward (same identity semantics).
    y_bwd = t.backward(x)
    y_bwd = jax.block_until_ready(y_bwd)
    assert bool(jnp.all(y_bwd == x)), "backward identity mismatch"

    print("KERNEL_OK")
</pallas_src>

<mosaic_0001>
module attributes {stable_mosaic.version = 11 : i64} {
  func.func @_hbm_copy_kernel(%arg0: memref<2x4x16x16xf32, #tpu.memory_space<any>>, %arg1: memref<2x4x16x16xf32, #tpu.memory_space<any>>, %arg2: memref<!tpu.dma_semaphore, #tpu.memory_space<semaphore_mem>>) attributes {dimension_semantics = [], scalar_prefetch = 0 : i64, scratch_operands = 1 : i64, tpu.core_type = #tpu.core_type<tc>} {
    tpu.enqueue_dma source(%arg0 : memref<2x4x16x16xf32, #tpu.memory_space<any>>) target(%arg1 : memref<2x4x16x16xf32, #tpu.memory_space<any>>) target_semaphore(%arg2 : memref<!tpu.dma_semaphore, #tpu.memory_space<semaphore_mem>>)
    tpu.wait_dma2 semaphore(%arg2 : memref<!tpu.dma_semaphore, #tpu.memory_space<semaphore_mem>>) src(%arg0 : memref<2x4x16x16xf32, #tpu.memory_space<any>>) dst(%arg1 : memref<2x4x16x16xf32, #tpu.memory_space<any>>)
    return
  }
}

</mosaic_0001>

<bundles_post_ra>
// kernel: tpu_custom_call.1
= control target key start
LH: loop header
LB: loop body
LE: loop exit
PB: predicated region body
PF: predicated region fallthrough
CT: control target
= control target key end

     0   :  { %s34_s12 = smov [#allocation2]   ;;  %s35_s13 = smov [#allocation3]   ;;  %s53_s0 = inlined_call_operand.hbm [shape: f32[2,4,16,16], index: 0, kind: input, shape index: {}]   ;;  %s54_s1 = inlined_call_operand.hbm [shape: f32[2,4,16,16], index: 1, kind: output, shape index: {}]  }
   0x1   :  { %s10_s8 = sshll.u32 %s53_s0, 4  ;;  %s12_s11 = sshll.u32 %s54_s1, 4  ;;  %s11_s8 = int_to_ptr.hbm [resolvable:$true] %s10_s8  ;;  %s13_s11 = int_to_ptr.hbm [resolvable:$true] %s12_s11 }
   0x2   :  { %s36_s14 = smov 0  }
   0x3   :  { %16 = dma.general %s11_s8, 2048, %s13_s11, %s34_s12, %s35_s13, [#allocation4], %s36_s14, 0  }
   0x4   :  { %32 = dma.done.wait [#allocation2], 2048 }
   0x5   :  { %33 = vsyncadd [#allocation2], 4294965248 }
   0x6   :  { %22 = vsyncmov [#allocation2] }
   0x9   :  { %s23_s15 = vpop.sfrf %22 }
   0xa   :  { %p28_p0 = scmp.ne.s32.totalorder %s23_s15, 0 }
   0xc   :  { %27 = shalt.err (%p28_p0)  }

</bundles_post_ra>
